<compile_context>
chip_gen: v7x
topology: tpu7x:2x2x1
jax: 0.10.0
libtpu: 0.0.40
codegen_flags: <defaults>
</compile_context>

<pallas_src>
import functools

import jax
import jax.numpy as jnp
from jax import lax
from jax.experimental import pallas as pl
from jax.experimental.pallas import tpu as pltpu


def _basic_block_kernel(*refs, has_proj):
    if has_proj:
        (x_ref, w1_ref, b1_ref, w2_ref, b2_ref, wr_ref, br_ref, o_ref) = refs
    else:
        (x_ref, w1_ref, b1_ref, w2_ref, b2_ref, o_ref) = refs

    x2d = x_ref[0]                          # (H, W*Cin), f32, lane = (w, ci)

    def conv3x3(src, w_ref):
        # src: (H, W*C) f32.  w_ref: (3, W*C, W*Cout) bf16 banded weights
        # (BN scale already folded in).  Row shifts realize the kh taps; the
        # kw taps and SAME zero-padding are encoded in the band structure.
        zrow = jnp.zeros((1, src.shape[1]), src.dtype)
        up = jnp.concatenate([zrow, src[:-1, :]], axis=0)    # row h -> src h-1
        down = jnp.concatenate([src[1:, :], zrow], axis=0)   # row h -> src h+1
        acc = jnp.dot(up.astype(jnp.bfloat16), w_ref[0],
                      preferred_element_type=jnp.float32)
        acc = acc + jnp.dot(src.astype(jnp.bfloat16), w_ref[1],
                            preferred_element_type=jnp.float32)
        acc = acc + jnp.dot(down.astype(jnp.bfloat16), w_ref[2],
                            preferred_element_type=jnp.float32)
        return acc                           # (H, W*Cout) f32

    # ---- conv1 (+ folded BN1 scale) + bias + ReLU ----
    h1 = jnp.maximum(conv3x3(x2d, w1_ref) + b1_ref[...], 0.0)   # (H, W*Cout)

    # ---- conv2 (+ folded BN2 scale) + bias ----
    out2 = conv3x3(h1, w2_ref) + b2_ref[...]

    # ---- residual branch ----
    if has_proj:
        res = jnp.dot(x2d.astype(jnp.bfloat16), wr_ref[...],
                      preferred_element_type=jnp.float32) + br_ref[...]
    else:
        res = x2d    # Cin == Cout, identical (H, W*C) lane layout

    # ---- add + final ReLU (lane-dense store, 128 lanes) ----
    o_ref[0] = jnp.maximum(out2 + res, 0.0)


def basic_block_pallas(x_nhwc, params, stride=1):
    # TODO(synk): stride > 1 path not implemented in-kernel.
    assert stride == 1, "only stride=1 is implemented in the Pallas kernel"
    N, H, W, Cin = x_nhwc.shape
    Cout = params["w1"].shape[-1]
    has_proj = (stride != 1) or (Cin != Cout)

    def fold_bn(gamma, beta, mean, var, eps=1e-5):
        scale = gamma / jnp.sqrt(var + eps)
        return scale, beta - mean * scale

    def banded_3x3(w_hwio, scale):
        # (3,3,Ci,Co) HWIO weights + per-Co BN scale  ->  (3, W*Ci, W*Cout)
        # banded matmul weights in bf16.
        # B[kh, w'*Ci+ci, w*Co+co] = w[kh, w'-w+1, ci, co]*scale[co]  if |w'-w|<=1.
        _, _, Ci, Co = w_hwio.shape
        wf = w_hwio * scale                         # fold BN scale into weights
        wsrc = jnp.arange(W)[:, None]               # source column w'
        wdst = jnp.arange(W)[None, :]               # output column w
        B5 = jnp.zeros((3, W, Ci, W, Co), jnp.float32)
        for kw in range(3):
            mask = (wsrc == wdst + (kw - 1)).astype(jnp.float32)     # (W, W)
            B5 = B5 + wf[:, kw][:, None, :, None, :] * mask[None, :, None, :, None]
        return B5.reshape(3, W * Ci, W * Co).astype(jnp.bfloat16)

    def tiled_bias(bias):
        # per-channel bias -> per-lane bias for the (w, co) lane layout
        return jnp.tile(bias, W).reshape(1, W * Cout).astype(jnp.float32)

    s1, b1 = fold_bn(*params["bn1"])
    s2, b2 = fold_bn(*params["bn2"])
    w1 = banded_3x3(params["w1"], s1)               # (3, W*Cin,  W*Cout)
    w2 = banded_3x3(params["w2"], s2)               # (3, W*Cout, W*Cout)

    x2d = x_nhwc.reshape(N, H, W * Cin)             # free reshape, no HBM copy

    inputs = [x2d, w1, tiled_bias(b1), w2, tiled_bias(b2)]
    in_specs = [
        pl.BlockSpec((1, H, W * Cin), lambda n: (n, 0, 0)),
        pl.BlockSpec((3, W * Cin, W * Cout), lambda n: (0, 0, 0)),
        pl.BlockSpec((1, W * Cout), lambda n: (0, 0)),
        pl.BlockSpec((3, W * Cout, W * Cout), lambda n: (0, 0, 0)),
        pl.BlockSpec((1, W * Cout), lambda n: (0, 0)),
    ]
    if has_proj:
        sres, bres = fold_bn(*params["bn_res"])
        wres_f = params["w_res"][0, 0] * sres       # (Cin, Cout), scale folded
        eyeW = jnp.eye(W, dtype=jnp.float32)
        wres_banded = (wres_f[None, :, None, :] * eyeW[:, None, :, None]
                       ).reshape(W * Cin, W * Cout).astype(jnp.bfloat16)
        inputs += [wres_banded, tiled_bias(bres)]
        in_specs += [
            pl.BlockSpec((W * Cin, W * Cout), lambda n: (0, 0)),
            pl.BlockSpec((1, W * Cout), lambda n: (0, 0)),
        ]

    kernel = functools.partial(_basic_block_kernel, has_proj=has_proj)

    out = pl.pallas_call(
        kernel,
        out_shape=jax.ShapeDtypeStruct((N, H, W * Cout), jnp.float32),
        grid=(N,),
        in_specs=in_specs,
        out_specs=pl.BlockSpec((1, H, W * Cout), lambda n: (n, 0, 0)),
        compiler_params=pltpu.CompilerParams(
            dimension_semantics=("parallel",),
            vmem_limit_bytes=32 * 1024 * 1024),
    )(*inputs)
    return out.reshape(N, H, W, Cout)


def basic_block_reference(x_nhwc, params, stride=1):
    # Pure-JAX f32 reference (inference-mode BN), NHWC/HWIO conv.
    dn = ("NHWC", "HWIO", "NHWC")

    def fold_bn(gamma, beta, mean, var, eps=1e-5):
        scale = gamma / jnp.sqrt(var + eps)
        return scale, beta - mean * scale

    s1, b1 = fold_bn(*params["bn1"])
    s2, b2 = fold_bn(*params["bn2"])
    h = lax.conv_general_dilated(x_nhwc, params["w1"], (stride, stride), "SAME",
                                 dimension_numbers=dn)
    h = jnp.maximum(h * s1 + b1, 0.0)
    h = lax.conv_general_dilated(h, params["w2"], (1, 1), "SAME",
                                 dimension_numbers=dn)
    h = h * s2 + b2

    Cin, Cout = x_nhwc.shape[-1], params["w1"].shape[-1]
    if stride != 1 or Cin != Cout:
        sres, bres = fold_bn(*params["bn_res"])
        idn = lax.conv_general_dilated(x_nhwc, params["w_res"], (stride, stride),
                                       "VALID", dimension_numbers=dn)
        idn = idn * sres + bres
    else:
        idn = x_nhwc
    return jnp.maximum(h + idn, 0.0)


if __name__ == "__main__":
    key = jax.random.PRNGKey(0)
    keys = jax.random.split(key, 32)

    def bn_params(k, c):
        k1, k2, k3, k4 = jax.random.split(k, 4)
        gamma = jax.random.uniform(k1, (c,), jnp.float32, 0.5, 1.5)
        beta = jax.random.normal(k2, (c,), jnp.float32) * 0.1
        mean = jax.random.normal(k3, (c,), jnp.float32) * 0.1
        var = jax.random.uniform(k4, (c,), jnp.float32, 0.5, 1.5)
        return (gamma, beta, mean, var)

    def make_case(kofs, N, Cin, Cout, H, W):
        # Inputs/weights generated in PyTorch NCHW / OIHW layout, converted.
        x_nchw = jax.random.normal(keys[kofs + 0], (N, Cin, H, W), jnp.float32)
        x_nhwc = jnp.transpose(x_nchw, (0, 2, 3, 1))
        w1_oihw = jax.random.normal(keys[kofs + 1], (Cout, Cin, 3, 3), jnp.float32) * 0.2
        w2_oihw = jax.random.normal(keys[kofs + 2], (Cout, Cout, 3, 3), jnp.float32) * 0.2
        params = {
            "w1": jnp.transpose(w1_oihw, (2, 3, 1, 0)),      # HWIO (3,3,Cin,Cout)
            "w2": jnp.transpose(w2_oihw, (2, 3, 1, 0)),
            "bn1": bn_params(keys[kofs + 4], Cout),
            "bn2": bn_params(keys[kofs + 5], Cout),
        }
        if Cin != Cout:
            wr_oihw = jax.random.normal(keys[kofs + 3], (Cout, Cin, 1, 1), jnp.float32) * 0.2
            params["w_res"] = jnp.transpose(wr_oihw, (2, 3, 1, 0))  # (1,1,Cin,Cout)
            params["bn_res"] = bn_params(keys[kofs + 6], Cout)
        return x_nhwc, params

    # Case A: projection residual branch (Cin != Cout), x NCHW = (2, 4, 16, 16)
    x_a, p_a = make_case(0, N=2, Cin=4, Cout=8, H=16, W=16)
    out_a = jax.block_until_ready(basic_block_pallas(x_a, p_a, stride=1))
    ref_a = basic_block_reference(x_a, p_a, stride=1)
    assert out_a.shape == ref_a.shape
    # bf16 matmuls vs f32 reference -> loosened tolerance.
    assert jnp.allclose(out_a, ref_a, rtol=5e-2, atol=1e-1), (
        f"case A max abs err {jnp.max(jnp.abs(out_a - ref_a))}")

    # Case B: identity residual branch (Cin == Cout)
    x_b, p_b = make_case(8, N=2, Cin=8, Cout=8, H=16, W=16)
    out_b = jax.block_until_ready(basic_block_pallas(x_b, p_b, stride=1))
    ref_b = basic_block_reference(x_b, p_b, stride=1)
    assert out_b.shape == ref_b.shape
    assert jnp.allclose(out_b, ref_b, rtol=5e-2, atol=1e-1), (
        f"case B max abs err {jnp.max(jnp.abs(out_b - ref_b))}")

    print("KERNEL_OK")
</pallas_src>

<mosaic_0001>
module attributes {stable_mosaic.version = 11 : i64} {
  func.func @_basic_block_kernel(%arg0: i32, %arg1: memref<1x16x64xf32, #tpu.memory_space<vmem>>, %arg2: memref<3x64x128xbf16, #tpu.memory_space<vmem>>, %arg3: memref<1x128xf32, #tpu.memory_space<vmem>>, %arg4: memref<3x128x128xbf16, #tpu.memory_space<vmem>>, %arg5: memref<1x128xf32, #tpu.memory_space<vmem>>, %arg6: memref<64x128xbf16, #tpu.memory_space<vmem>>, %arg7: memref<1x128xf32, #tpu.memory_space<vmem>>, %arg8: memref<1x16x128xf32, #tpu.memory_space<vmem>>) attributes {dimension_semantics = [#tpu.dimension_semantics<parallel>], iteration_bounds = array<i64: 2>, scalar_prefetch = 0 : i64, scratch_operands = 0 : i64, tpu.core_type = #tpu.core_type<tc>, window_params = [{transform_indices = @transform_0, window_bounds = array<i64: 1, 16, 64>}, {pipeline_mode = #tpu.pipeline_mode<synchronous>, transform_indices = @transform_1, window_bounds = array<i64: 3, 64, 128>}, {pipeline_mode = #tpu.pipeline_mode<synchronous>, transform_indices = @transform_2, window_bounds = array<i64: 1, 128>}, {pipeline_mode = #tpu.pipeline_mode<synchronous>, transform_indices = @transform_3, window_bounds = array<i64: 3, 128, 128>}, {pipeline_mode = #tpu.pipeline_mode<synchronous>, transform_indices = @transform_4, window_bounds = array<i64: 1, 128>}, {pipeline_mode = #tpu.pipeline_mode<synchronous>, transform_indices = @transform_5, window_bounds = array<i64: 64, 128>}, {pipeline_mode = #tpu.pipeline_mode<synchronous>, transform_indices = @transform_6, window_bounds = array<i64: 1, 128>}, {transform_indices = @transform_7, window_bounds = array<i64: 1, 16, 128>}]} {
    %c0 = arith.constant 0 : index
    %c0_0 = arith.constant 0 : index
    %c0_1 = arith.constant 0 : index
    %0 = vector.load %arg1[%c0, %c0_0, %c0_1] : memref<1x16x64xf32, #tpu.memory_space<vmem>>, vector<1x16x64xf32>
    %1 = vector.shape_cast %0 : vector<1x16x64xf32> to vector<16x64xf32>
    %cst = arith.constant 0.000000e+00 : f32
    %2 = vector.broadcast %cst : f32 to vector<1x64xf32>
    %3 = vector.extract_strided_slice %1 {offsets = [0, 0], sizes = [15, 64], strides = [1, 1]} : vector<16x64xf32> to vector<15x64xf32>
    %4 = tpu.concatenate %2, %3 in 0 : vector<1x64xf32>, vector<15x64xf32> -> vector<16x64xf32>
    %5 = vector.extract_strided_slice %1 {offsets = [1, 0], sizes = [15, 64], strides = [1, 1]} : vector<16x64xf32> to vector<15x64xf32>
    %6 = tpu.concatenate %5, %2 in 0 : vector<15x64xf32>, vector<1x64xf32> -> vector<16x64xf32>
    %7 = arith.truncf %4 : vector<16x64xf32> to vector<16x64xbf16>
    %c0_2 = arith.constant 0 : index
    %c0_3 = arith.constant 0 : index
    %c0_4 = arith.constant 0 : index
    %8 = vector.load %arg2[%c0_2, %c0_3, %c0_4] : memref<3x64x128xbf16, #tpu.memory_space<vmem>>, vector<1x64x128xbf16>
    %9 = vector.shape_cast %8 : vector<1x64x128xbf16> to vector<64x128xbf16>
    %cst_5 = arith.constant dense<0.000000e+00> : vector<16x128xf32>
    %10 = tpu.matmul %7, %9, %cst_5 {dimension_numbers = #tpu.dot_dimension_numbers<[1], [0], [0], [1], [0, 0, 1, 1], [], []>} : vector<16x64xbf16>, vector<64x128xbf16>, vector<16x128xf32> -> vector<16x128xf32>
    %11 = arith.truncf %1 : vector<16x64xf32> to vector<16x64xbf16>
    %c1 = arith.constant 1 : index
    %c0_6 = arith.constant 0 : index
    %c0_7 = arith.constant 0 : index
    %12 = vector.load %arg2[%c1, %c0_6, %c0_7] : memref<3x64x128xbf16, #tpu.memory_space<vmem>>, vector<1x64x128xbf16>
    %13 = vector.shape_cast %12 : vector<1x64x128xbf16> to vector<64x128xbf16>
    %cst_8 = arith.constant dense<0.000000e+00> : vector<16x128xf32>
    %14 = tpu.matmul %11, %13, %cst_8 {dimension_numbers = #tpu.dot_dimension_numbers<[1], [0], [0], [1], [0, 0, 1, 1], [], []>} : vector<16x64xbf16>, vector<64x128xbf16>, vector<16x128xf32> -> vector<16x128xf32>
    %15 = arith.addf %10, %14 : vector<16x128xf32>
    %16 = arith.truncf %6 : vector<16x64xf32> to vector<16x64xbf16>
    %c2 = arith.constant 2 : index
    %c0_9 = arith.constant 0 : index
    %c0_10 = arith.constant 0 : index
    %17 = vector.load %arg2[%c2, %c0_9, %c0_10] : memref<3x64x128xbf16, #tpu.memory_space<vmem>>, vector<1x64x128xbf16>
    %18 = vector.shape_cast %17 : vector<1x64x128xbf16> to vector<64x128xbf16>
    %cst_11 = arith.constant dense<0.000000e+00> : vector<16x128xf32>
    %19 = tpu.matmul %16, %18, %cst_11 {dimension_numbers = #tpu.dot_dimension_numbers<[1], [0], [0], [1], [0, 0, 1, 1], [], []>} : vector<16x64xbf16>, vector<64x128xbf16>, vector<16x128xf32> -> vector<16x128xf32>
    %20 = arith.addf %15, %19 : vector<16x128xf32>
    %c0_12 = arith.constant 0 : index
    %c0_13 = arith.constant 0 : index
    %21 = vector.load %arg3[%c0_12, %c0_13] : memref<1x128xf32, #tpu.memory_space<vmem>>, vector<1x128xf32>
    %22 = vector.broadcast %21 : vector<1x128xf32> to vector<16x128xf32>
    %23 = arith.addf %20, %22 : vector<16x128xf32>
    %cst_14 = arith.constant 0.000000e+00 : f32
    %24 = vector.broadcast %cst_14 : f32 to vector<16x128xf32>
    %25 = arith.maximumf %23, %24 : vector<16x128xf32>
    %cst_15 = arith.constant 0.000000e+00 : f32
    %26 = vector.broadcast %cst_15 : f32 to vector<1x128xf32>
    %27 = vector.extract_strided_slice %25 {offsets = [0, 0], sizes = [15, 128], strides = [1, 1]} : vector<16x128xf32> to vector<15x128xf32>
    %28 = tpu.concatenate %26, %27 in 0 : vector<1x128xf32>, vector<15x128xf32> -> vector<16x128xf32>
    %29 = vector.extract_strided_slice %25 {offsets = [1, 0], sizes = [15, 128], strides = [1, 1]} : vector<16x128xf32> to vector<15x128xf32>
    %30 = tpu.concatenate %29, %26 in 0 : vector<15x128xf32>, vector<1x128xf32> -> vector<16x128xf32>
    %31 = arith.truncf %28 : vector<16x128xf32> to vector<16x128xbf16>
    %c0_16 = arith.constant 0 : index
    %c0_17 = arith.constant 0 : index
    %c0_18 = arith.constant 0 : index
    %32 = vector.load %arg4[%c0_16, %c0_17, %c0_18] : memref<3x128x128xbf16, #tpu.memory_space<vmem>>, vector<1x128x128xbf16>
    %33 = vector.shape_cast %32 : vector<1x128x128xbf16> to vector<128x128xbf16>
    %cst_19 = arith.constant dense<0.000000e+00> : vector<16x128xf32>
    %34 = tpu.matmul %31, %33, %cst_19 {dimension_numbers = #tpu.dot_dimension_numbers<[1], [0], [0], [1], [0, 0, 1, 1], [], []>} : vector<16x128xbf16>, vector<128x128xbf16>, vector<16x128xf32> -> vector<16x128xf32>
    %35 = arith.truncf %25 : vector<16x128xf32> to vector<16x128xbf16>
    %c1_20 = arith.constant 1 : index
    %c0_21 = arith.constant 0 : index
    %c0_22 = arith.constant 0 : index
    %36 = vector.load %arg4[%c1_20, %c0_21, %c0_22] : memref<3x128x128xbf16, #tpu.memory_space<vmem>>, vector<1x128x128xbf16>
    %37 = vector.shape_cast %36 : vector<1x128x128xbf16> to vector<128x128xbf16>
    %cst_23 = arith.constant dense<0.000000e+00> : vector<16x128xf32>
    %38 = tpu.matmul %35, %37, %cst_23 {dimension_numbers = #tpu.dot_dimension_numbers<[1], [0], [0], [1], [0, 0, 1, 1], [], []>} : vector<16x128xbf16>, vector<128x128xbf16>, vector<16x128xf32> -> vector<16x128xf32>
    %39 = arith.addf %34, %38 : vector<16x128xf32>
    %40 = arith.truncf %30 : vector<16x128xf32> to vector<16x128xbf16>
    %c2_24 = arith.constant 2 : index
    %c0_25 = arith.constant 0 : index
    %c0_26 = arith.constant 0 : index
    %41 = vector.load %arg4[%c2_24, %c0_25, %c0_26] : memref<3x128x128xbf16, #tpu.memory_space<vmem>>, vector<1x128x128xbf16>
    %42 = vector.shape_cast %41 : vector<1x128x128xbf16> to vector<128x128xbf16>
    %cst_27 = arith.constant dense<0.000000e+00> : vector<16x128xf32>
    %43 = tpu.matmul %40, %42, %cst_27 {dimension_numbers = #tpu.dot_dimension_numbers<[1], [0], [0], [1], [0, 0, 1, 1], [], []>} : vector<16x128xbf16>, vector<128x128xbf16>, vector<16x128xf32> -> vector<16x128xf32>
    %44 = arith.addf %39, %43 : vector<16x128xf32>
    %c0_28 = arith.constant 0 : index
    %c0_29 = arith.constant 0 : index
    %45 = vector.load %arg5[%c0_28, %c0_29] : memref<1x128xf32, #tpu.memory_space<vmem>>, vector<1x128xf32>
    %46 = vector.broadcast %45 : vector<1x128xf32> to vector<16x128xf32>
    %47 = arith.addf %44, %46 : vector<16x128xf32>
    %48 = arith.truncf %1 : vector<16x64xf32> to vector<16x64xbf16>
    %c0_30 = arith.constant 0 : index
    %c0_31 = arith.constant 0 : index
    %49 = vector.load %arg6[%c0_30, %c0_31] : memref<64x128xbf16, #tpu.memory_space<vmem>>, vector<64x128xbf16>
    %cst_32 = arith.constant dense<0.000000e+00> : vector<16x128xf32>
    %50 = tpu.matmul %48, %49, %cst_32 {dimension_numbers = #tpu.dot_dimension_numbers<[1], [0], [0], [1], [0, 0, 1, 1], [], []>} : vector<16x64xbf16>, vector<64x128xbf16>, vector<16x128xf32> -> vector<16x128xf32>
    %c0_33 = arith.constant 0 : index
    %c0_34 = arith.constant 0 : index
    %51 = vector.load %arg7[%c0_33, %c0_34] : memref<1x128xf32, #tpu.memory_space<vmem>>, vector<1x128xf32>
    %52 = vector.broadcast %51 : vector<1x128xf32> to vector<16x128xf32>
    %53 = arith.addf %50, %52 : vector<16x128xf32>
    %54 = arith.addf %47, %53 : vector<16x128xf32>
    %cst_35 = arith.constant 0.000000e+00 : f32
    %55 = vector.broadcast %cst_35 : f32 to vector<16x128xf32>
    %56 = arith.maximumf %54, %55 : vector<16x128xf32>
    %c0_36 = arith.constant 0 : index
    %c0_37 = arith.constant 0 : index
    %c0_38 = arith.constant 0 : index
    %57 = vector.load %arg8[%c0_36, %c0_37, %c0_38] : memref<1x16x128xf32, #tpu.memory_space<vmem>>, vector<1x16x128xf32>
    %58 = vector.shape_cast %57 : vector<1x16x128xf32> to vector<16x128xf32>
    %59 = vector.shape_cast %56 : vector<16x128xf32> to vector<1x16x128xf32>
    tpu.vector_store %arg8[%c0_36, %c0_37, %c0_38], %59 {strides = array<i32>} : memref<1x16x128xf32, #tpu.memory_space<vmem>>, vector<1x16x128xf32>,
    return
  }
  func.func @transform_0(%arg0: i32) -> (i32, i32, i32) {
    %c0_i32 = arith.constant 0 : i32
    %c0_i32_0 = arith.constant 0 : i32
    %c0_i32_1 = arith.constant 0 : i32
    return %arg0, %c0_i32, %c0_i32_0 : i32, i32, i32
  }
  func.func @transform_1(%arg0: i32) -> (i32, i32, i32) {
    %c0_i32 = arith.constant 0 : i32
    %c0_i32_0 = arith.constant 0 : i32
    %c0_i32_1 = arith.constant 0 : i32
    %c0_i32_2 = arith.constant 0 : i32
    return %c0_i32, %c0_i32_0, %c0_i32_1 : i32, i32, i32
  }
  func.func @transform_2(%arg0: i32) -> (i32, i32) {
    %c0_i32 = arith.constant 0 : i32
    %c0_i32_0 = arith.constant 0 : i32
    %c0_i32_1 = arith.constant 0 : i32
    return %c0_i32, %c0_i32_0 : i32, i32
  }
  func.func @transform_3(%arg0: i32) -> (i32, i32, i32) {
    %c0_i32 = arith.constant 0 : i32
    %c0_i32_0 = arith.constant 0 : i32
    %c0_i32_1 = arith.constant 0 : i32
    %c0_i32_2 = arith.constant 0 : i32
    return %c0_i32, %c0_i32_0, %c0_i32_1 : i32, i32, i32
  }
  func.func @transform_4(%arg0: i32) -> (i32, i32) {
    %c0_i32 = arith.constant 0 : i32
    %c0_i32_0 = arith.constant 0 : i32
    %c0_i32_1 = arith.constant 0 : i32
    return %c0_i32, %c0_i32_0 : i32, i32
  }
  func.func @transform_5(%arg0: i32) -> (i32, i32) {
    %c0_i32 = arith.constant 0 : i32
    %c0_i32_0 = arith.constant 0 : i32
    %c0_i32_1 = arith.constant 0 : i32
    return %c0_i32, %c0_i32_0 : i32, i32
  }
  func.func @transform_6(%arg0: i32) -> (i32, i32) {
    %c0_i32 = arith.constant 0 : i32
    %c0_i32_0 = arith.constant 0 : i32
    %c0_i32_1 = arith.constant 0 : i32
    return %c0_i32, %c0_i32_0 : i32, i32
  }
  func.func @transform_7(%arg0: i32) -> (i32, i32, i32) {
    %c0_i32 = arith.constant 0 : i32
    %c0_i32_0 = arith.constant 0 : i32
    %c0_i32_1 = arith.constant 0 : i32
    return %arg0, %c0_i32, %c0_i32_0 : i32, i32, i32
  }
}

</mosaic_0001>

<bundles_post_ra>
// kernel: tpu_custom_call.1
= control target key start
LH: loop header
LB: loop body
LE: loop exit
PB: predicated region body
PF: predicated region fallthrough
CT: control target
= control target key end

     0   :  { %12 = vsyncpa [#allocation3], 0  ;;  %s2122_s0 = inlined_call_operand.hbm [shape: f32[2,16,64], index: 0, kind: input, shape index: {}]   ;;  %s2123_s1 = inlined_call_operand.hbm [shape: bf16[3,64,128], index: 1, kind: input, shape index: {}]   ;;  %s2124_s2 = inlined_call_operand.vmem [shape: f32[1,128], index: 2, kind: input, shape index: {}]   ;;  %s2125_s3 = inlined_call_operand.hbm [shape: bf16[3,128,128], index: 3, kind: input, shape index: {}]   ;;  %s2126_s4 = inlined_call_operand.vmem [shape: f32[1,128], index: 4, kind: input, shape index: {}]   ;;  %s2127_s5 = inlined_call_operand.hbm [shape: bf16[64,128], index: 5, kind: input, shape index: {}]   ;;  %s2128_s6 = inlined_call_operand.vmem [shape: f32[1,128], index: 6, kind: input, shape index: {}]   ;;  %s2129_s7 = inlined_call_operand.hbm [shape: f32[2,16,128], index: 7, kind: output, shape index: {}]  }
   0x1   :  { %14 = vsyncpa [#allocation3 + $0x1], 0 }
   0x2   :  { %15 = vsyncpa [#allocation6], 0 }
   0x3   :  { %16 = vsyncpa [#allocation9], 0 }
   0x4   :  { %17 = vsyncpa [#allocation4], 0 }
   0x5   :  { %19 = vsyncpa [#allocation4 + $0x1], 0  ;;  %s1769_s24 = smov 0   ;;  %s1771_s25 = smov 0  }
   0x6   :  { %s1773_s26 = smov 0   ;;  %s1775_s27 = smov 0  }
   0x7 LB: > { %s1790_s28 = sadd.s32 4294967295, %s1713_s27   ;;  %s1154_s29 = sadd.s32 4294967294, %s1713_s27   ;;  %s1713_s27 = sphi %s1775_s27, %s2155_s27   ;;  %s1709_s26 = sphi %s1773_s26, %s2154_s26   ;;  %s1705_s25 = sphi %s1771_s25, %s2153_s25   ;;  %s1701_s24 = sphi %s1769_s24, %s2152_s24  }
   0x8   : > { %p45_p0 = scmp.ne.s32.totalorder %s1705_s25, %s1701_s24  ;;  %p2130_p1 = scmp.eq.s32.totalorder %s1790_s28, 0 }
   0x9   : > { %p201_p3 = scmp.eq.s32.totalorder %s1154_s29, 1  ;;  %p1155_p5 = scmp.ge.s32.totalorder %s1713_s27, 1 }
   0xa   : > { %p1799_p4 = por %p2130_p1, %p45_p0  ;;  %p208_p7 = scmp.lt.s32.totalorder %s1713_s27, 3 }
   0xb   : > { %p1804_p6 = por %p201_p3, %p45_p0  ;;  %s1715_s10 = smov [#allocation5]  }
   0xc   : > { %s2134_s30 = scalar_select %p1799_p4, 1, 0 }
   0xd   : > { %s2135_s8 = scalar_select %p1804_p6, 1, 0 }
   0xe   : > { %p1809_p8 = pnand %p1155_p5, %p208_p7  ;;  %s220_s11 = sshll.u32 %s1715_s10, 4  ;;  %s1813_s11 = int_to_ptr.vmem [resolvable:$true] %s220_s11 }
   0xf   : > { %2136 = sst [smem:[#allocation15_spill]] %s2135_s8  ;;  %s1716_s13 = smov [#allocation7]  }
  0x10   : > { %s2137_s9 = scalar_select %p1809_p8, 1, 0 }
  0x11   : > { %p1415_p9 = pneg %p1809_p8  ;;  %s236_s14 = sshll.u32 %s1716_s13, 4  ;;  %s1824_s14 = int_to_ptr.vmem [resolvable:$true] %s236_s14 }
  0x12   : > { %s1717_s15 = smov [#allocation8]   ;;  %s1525_s19 = scalar_lea.hbm %s2123_s1, 1536 }
  0x13   : > { %p1820_p11 = pnand %p1415_p9, %p2130_p1  ;;  %s1826_s16 = sshll.u32 %s1717_s15, 4  ;;  %s253_s16 = int_to_ptr.vmem [resolvable:$true] %s1826_s16 }
  0x14   : > { %p1526_p12 = scmp.ne.s32.totalorder %s2123_s1, %s1525_s19  ;;  %p1532_p5 = scmp.lt.u32.totalorder %s1525_s19, %s2123_s1 }
  0x15   : > { %p1836_p13 = pneg %p1820_p11 }
  0x17   : > { %p1528_p0 = pnand %p1836_p13, %p1526_p12 }
  0x19   : > { %p1529_p3 = pneg %p1528_p0 }
  0x1b   : > { %p1534_p7 = pnand %p1532_p5, %p1529_p3 }
  0x1d   : > { %1537 = shalt.err (!%p1534_p7)
}
  0x1e   : > { %s1538_s10 = scalar_lea.vmem %s1813_s11, 1536  ;;  %p1546_p2 = scmp.lt.s32.totalorder %s1813_s11, %s1813_s11 }
  0x1f   : > { %p1539_p9 = scmp.ne.s32.totalorder %s1813_s11, %s1538_s10  ;;  %p1547_p6 = scmp.lt.s32.totalorder %s1538_s10, %s1538_s10 }
  0x21   : > { %p1541_p10 = pnand %p1539_p9, %p1836_p13  ;;  %p1548_p12 = por %p1547_p6, %p1546_p2 }
  0x23   : > { %p1542_p1 = pneg %p1541_p10 }
  0x25   : > { %p1549_p0 = pnand %p1548_p12, %p1542_p1 }
  0x27   : > { %1552 = shalt.err (!%p1549_p0)
}
  0x28   : > { %s1718_s13 = smov 64   ;;  %s1719_s15 = smov 4  }
  0x29   : > { %1418 = dma.hbm_to_vmem [thread:$0]  (!%p1820_p11), %s2123_s1, 1536, %s1813_s11, [#allocation6], %s1718_s13, %s1718_s13, %s1719_s15  }
  0x2a   : > { %s1553_s21 = scalar_lea.hbm %s2125_s3, 3072 }
  0x2b   : > { %p1554_p1 = scmp.ne.s32.totalorder %s2125_s3, %s1553_s21  ;;  %p1560_p10 = scmp.lt.u32.totalorder %s1553_s21, %s2125_s3 }
  0x2d   : > { %p1556_p2 = pnand %p1554_p1, %p1836_p13 }
  0x2f   : > { %p1557_p6 = pneg %p1556_p2 }
  0x31   : > { %p1562_p3 = pnand %p1560_p10, %p1557_p6 }
  0x33   : > { %1565 = shalt.err (!%p1562_p3)
}
  0x34   : > { %s1566_s11 = scalar_lea.vmem %s1824_s14, 3072  ;;  %p1574_p12 = scmp.lt.s32.totalorder %s1824_s14, %s1824_s14 }
  0x35   : > { %p1567_p5 = scmp.ne.s32.totalorder %s1824_s14, %s1566_s11  ;;  %p1575_p0 = scmp.lt.s32.totalorder %s1566_s11, %s1566_s11 }
  0x37   : > { %p1569_p7 = pnand %p1567_p5, %p1836_p13  ;;  %p1576_p1 = por %p1575_p0, %p1574_p12 }
  0x39   : > { %p1570_p9 = pneg %p1569_p7 }
  0x3b   : > { %p1577_p2 = pnand %p1576_p1, %p1570_p9 }
  0x3d   : > { %1580 = shalt.err (!%p1577_p2)
}
  0x3e   : > { %1421 = dma.hbm_to_vmem [thread:$0]  (!%p1820_p11), %s2125_s3, 3072, %s1824_s14, [#allocation6], %s1718_s13, %s1718_s13, %s1719_s15  }
  0x3f   : > { %s1581_s20 = scalar_lea.hbm %s2127_s5, 512 }
  0x40   : > { %p1582_p6 = scmp.ne.s32.totalorder %s2127_s5, %s1581_s20  ;;  %p1588_p5 = scmp.lt.u32.totalorder %s1581_s20, %s2127_s5 }
  0x42   : > { %p1584_p10 = pnand %p1582_p6, %p1836_p13 }
  0x44   : > { %p1585_p3 = pneg %p1584_p10 }
  0x46   : > { %p1590_p7 = pnand %p1588_p5, %p1585_p3 }
  0x48   : > { %1593 = shalt.err (!%p1590_p7)
}
  0x49   : > { %s1594_s11 = scalar_lea.vmem %s253_s16, 512  ;;  %p1602_p1 = scmp.lt.s32.totalorder %s253_s16, %s253_s16 }
  0x4a   : > { %p1595_p9 = scmp.ne.s32.totalorder %s253_s16, %s1594_s11  ;;  %p1603_p2 = scmp.lt.s32.totalorder %s1594_s11, %s1594_s11 }
  0x4c   : > { %p1597_p12 = pnand %p1595_p9, %p1836_p13  ;;  %p1604_p4 = por %p1603_p2, %p1602_p1 }
  0x4e   : > { %p1598_p0 = pneg %p1597_p12 }
  0x50   : > { %p1605_p8 = pnand %p1604_p4, %p1598_p0 }
  0x52   : > { %1608 = shalt.err (!%p1605_p8)
}
  0x53   : > { %1424 = dma.hbm_to_vmem [thread:$0]  (!%p1820_p11), %s2127_s5, 512, %s253_s16, [#allocation9], %s1718_s13, %s1718_s13, %s1719_s15  }
  0x54   : > { %s1909_s22 = sadd.s32 1, %s1713_s27   ;;  %s32_s17 = sadd.s32 1, %s1709_s26 }
  0x55   : > { %s29_s12 = ssub.s32 %s1713_s27, %s1909_s22  ;;  %p39_p8 = scmp.ne.s32.totalorder %s1709_s26, %s1705_s25 }
  0x56   : > { %p30_p4 = scmp.eq.s32.totalorder %s29_s12, 0  ;;  %p40_p13 = scmp.eq.s32.totalorder %s1713_s27, 0 }
  0x57   : > { %p1436_p6 = scmp.lt.s32.totalorder %s1713_s27, 2  ;;  %p2140_p3 = scmp.eq.s32.totalorder %s1790_s28, 1 }
  0x58   : > { %s1919_s18 = scalar_select %p30_p4, %s1709_s26, %s32_s17  }
  0x59   : > { %p41_p10 = por %p40_p13, %p39_p8  ;;  %p1923_p5 = por %p2140_p3, %p39_p8 }
  0x5a   : > { %s269_s20 = sand.u32 1, %s1709_s26   ;;  %s1228_s21 = sshll.u32 %s1713_s27, 8 }
  0x5b   : > { %s1160_s16 = sshll.u32 %s269_s20, 4  ;;  %s1932_s23 = scalar_lea.hbm %s2122_s0, %s1228_s21 }
  0x5c   : > { %s273_s29 = scalar_lea.vmem [#allocation2], %s1160_s16  ;;  %p1934_p11 = pnand %p1436_p6, %p41_p10 }
  0x5d   : > { %s280_s10 = sshll.u32 %s273_s29, 4  ;;  %s1940_s14 = scalar_lea.sflag [#allocation3], %s269_s20  ;;  %s1938_s10 = int_to_ptr.vmem [resolvable:$true] %s280_s10 }
  0x5e   : > { %s1609_s8 = scalar_lea.hbm %s1932_s23, 256  ;;  %p1611_p9 = pneg %p1934_p11 }
  0x5f   : > { %p1610_p7 = scmp.ne.s32.totalorder %s1932_s23, %s1609_s8  ;;  %s1614_s21 = scalar_lea.hbm %s2122_s0, 512 }
  0x60   : > { %p1615_p1 = scmp.lt.u32.totalorder %s1932_s23, %s2122_s0  ;;  %p1616_p2 = scmp.lt.u32.totalorder %s1614_s21, %s1609_s8 }
  0x61   : > { %p1612_p12 = pnand %p1611_p9, %p1610_p7  ;;  %p1618_p8 = scmp.lt.u32.totalorder %s1609_s8, %s1932_s23 }
  0x62   : > { %p1617_p4 = por %p1616_p2, %p1615_p1 }
  0x63   : > { %p1613_p0 = pneg %p1612_p12 }
  0x64   : > { %p1619_p13 = por %p1618_p8, %p1617_p4 }
  0x66   : > { %p1620_p6 = pnand %p1619_p13, %p1613_p0 }
  0x68   : > { %1623 = shalt.err (!%p1620_p6)
}
  0x69   : > { %s1624_s20 = scalar_lea.vmem %s1938_s10, 256  ;;  %s1720_s15 = smov [#allocation2]  }
  0x6a   : > { %p1625_p10 = scmp.ne.s32.totalorder %s1938_s10, %s1624_s20  ;;  %s1629_s29 = sshll.u32 %s1720_s15, 4  ;;  %s1630_s29 = int_to_ptr.vmem [resolvable:$false] %s1629_s29 }
  0x6b   : > { %s1631_s12 = scalar_lea.vmem %s1630_s29, 512  ;;  %p1632_p12 = scmp.lt.s32.totalorder %s1938_s10, %s1630_s29 }
  0x6c   : > { %p1627_p3 = pnand %p1625_p10, %p1611_p9  ;;  %p1633_p1 = scmp.lt.s32.totalorder %s1631_s12, %s1624_s20 }
  0x6e   : > { %p1628_p7 = pneg %p1627_p3  ;;  %p1634_p2 = por %p1633_p1, %p1632_p12 }
  0x70   : > { %p1635_p4 = pnand %p1634_p2, %p1628_p7 }
  0x72   : > { %1638 = shalt.err (!%p1635_p4)
}
  0x73   : > { %s1721_s8 = smov 128   ;;  %s1722_s17 = smov 8  }
  0x74   : > { %1428 = dma.hbm_to_vmem [thread:$0]  (!%p1934_p11), %s1932_s23, 256, %s1938_s10, %s1940_s14, %s1721_s8, %s1721_s8, %s1722_s17  }
  0x75   : > { %p2143_p9 = scmp.ne.s32.totalorder %s2137_s9, 0 }
  0x76   : > { %s1971_s21 = sand.u32 (!%p2143_p9), 1, %s1705_s25   ;;  %p2144_p0 = scmp.ne.s32.totalorder (!%p2143_p9), %s2134_s30, 0 }
  0x77   : > { %292 = sbr.rel (%p2143_p9) target bundleno = 690 (0x2b2), region = 48  ;;  %s1164_s16 = sshll.u32 (!%p2143_p9), %s1971_s21, 4 }
  0x78   : > { %s295_s13 = scalar_lea.sflag (!%p2143_p9), [#allocation3], %s1971_s21  ;;  %s298_s20 = scalar_lea.vmem (!%p2143_p9), [#allocation2], %s1164_s16 }
  0x7e   : > { %1684 = dma.done.wait (%p2144_p0), %s295_s13, 256  }
  0x7f   : > { %1686 = vsyncadd (%p2144_p0), %s295_s13, 4294967040  ;;  %p2145_p11 = scmp.eq.s32.totalorder %s1790_s28, 0 }
  0x81   : > { %1688 = dma.done.wait (%p2145_p11), [#allocation6], 4608   ;;  %p2146_p8 = pmov %p2145_p11 }
  0x83   : > { %1690 = vsyncadd (%p2146_p8), [#allocation6], 4294962688  ;;  %p2147_p13 = pmov %p2146_p8 }
  0x84   : > { %p2148_p6 = pmov %p2146_p8 }
  0x85   : > { %1692 = dma.done.wait (%p2147_p13), [#allocation9], 512  }
  0x86   : > { %1694 = vsyncadd (%p2148_p6), [#allocation9], 4294966784  ;;  %v1723_v0 = vmov 0.0   ;;  %vm1724_vm0 = vmmov 0   ;;  %v1485_v1 = vld [vmem:[#allocation5 + $0x20] sm:$0xff]   ;;  %v1486_v2 = vld [vmem:[#allocation5 + $0x28] sm:$0xff]  }
  0x87   : > { %1277 = vmatprep.subr.bf16.mxu0 %v1723_v0  ;;  %1285 = vmatprep.mubr.msk.bf16.mxu0 %vm1724_vm0, %v1723_v0  ;;  %v1487_v3 = vld [vmem:[#allocation5 + $0x30] sm:$0xff]   ;;  %v1488_v5 = vld [vmem:[#allocation5 + $0x38] sm:$0xff]   ;;  %vm346_vm1 = vcmask 1040384   ;;  %vm403_vm2 = vcmask 523264   ;;  %v1489_v10 = vld [vmem:[#allocation5] sm:$0xff]   ;;  %vm353_vm3 = vcmask 1046528  }
  0x88   : > { %1333 = vmatprep.subr.bf16.mxu1 %v1723_v0  ;;  %1349 = vmatprep.mubr.msk.bf16.mxu1 %vm1724_vm0, %v1723_v0  ;;  %v342_v4 = vld [vmem:[%s298_s20] sm:$0xff]  ;;  %v343_v7 = vld [vmem:[%s298_s20 + $0x8] sm:$0xff]  ;;  %vm1201_vm4 = vmneg %vm346_vm1  ;;  %vm1725_vm5 = vmmov 1   ;;  %s340_s15 = scalar_lea.vmem [#allocation10], %s1164_s16  ;;  %s1229_s12 = sshll.u32 %s1790_s28, 8 }
  0x89   : > { %1278 = vmatpush3.bf16.msra.mxu0 %v1485_v1  ;;  %v347_v6 = vrot.slane %v342_v4, 7  ;;  %v348_v8 = vrot.slane %v343_v7, 7  ;;  %v1998_v9 = vpack.c.bf16 %v343_v7, %v342_v4  ;;  %v1490_v12 = vld [vmem:[#allocation5 + $0x8] sm:$0xff]   ;;  %v1491_v13 = vld [vmem:[#allocation5 + $0x10] sm:$0xff]   ;;  %v1492_v14 = vld [vmem:[#allocation5 + $0x18] sm:$0xff]   ;;  %v354_v19 = vrot.slane %v342_v4, 1  ;;  %s2078_s13 = scalar_lea.hbm %s2129_s7, %s1229_s12 }
  0x8a   : > { %1279 = vmatprep.subr.bf16.mxu0 %v1723_v0  ;;  %v1493_v16 = vld [vmem:[#allocation5 + $0x40] sm:$0xff]   ;;  %v1494_v18 = vld [vmem:[#allocation5 + $0x48] sm:$0xff]   ;;  %v355_v20 = vrot.slane %v343_v7, 1  ;;  %v1495_v21 = vld [vmem:[#allocation5 + $0x50] sm:$0xff]   ;;  %s1052_s29 = sshll.u32 %s340_s15, 4  ;;  %s1039_s16 = scalar_lea.sflag [#allocation4], %s1971_s21  ;;  %s2073_s29 = int_to_ptr.vmem [resolvable:$true] %s1052_s29 }
  0x8b   : > { %v352_v11 = vsel %vm346_vm1, 0.0, %v347_v6  ;;  %v349_v15 = vsel %vm346_vm1, %v347_v6, %v348_v8  ;;  %v1496_v22 = vld [vmem:[#allocation5 + $0x58] sm:$0xff]   ;;  %v1497_v26 = vld [vmem:[#allocation7 + $0x40] sm:$0xff]   ;;  %v1499_v28 = vld [vmem:[#allocation7 + $0x48] sm:$0xff]   ;;  %s1639_s20 = scalar_lea.vmem %s2073_s29, 256  ;;  %s1726_s28 = smov [#allocation10]  }
  0x8c   : > { %v360_v17 = vpack.c.bf16 %v349_v15, %v352_v11  ;;  %v356_v23 = vsel %vm353_vm3, %v354_v19, %v355_v20  ;;  %v359_v24 = vsel %vm353_vm3, %v355_v20, 0.0  ;;  %v1498_v27 = vld [vmem:[#allocation7] sm:$0xff]   ;;  %v1500_v29 = vld [vmem:[#allocation7 + $0x8] sm:$0xff]   ;;  %v1501_v30 = vld [vmem:[#allocation7 + $0x50] sm:$0xff]   ;;  %p1640_p10 = scmp.ne.s32.totalorder %s2073_s29, %s1639_s20  ;;  %s1643_s30 = sshll.u32 %s1726_s28, 4  ;;  %s1644_s30 = int_to_ptr.vmem [resolvable:$false] %s1643_s30 }
  0x8d   : > { %1280 = vmatpush3.bf16.msra.mxu0 %v1486_v2  ;;  %v516_v25 = vpack.c.bf16 %v359_v24, %v356_v23  ;;  %1334 = vmatpush3.bf16.msra.mxu1 %v1498_v27  ;;  %v1502_v31 = vld [vmem:[#allocation7 + $0x10] sm:$0xff]   ;;  %v1503_v32 = vld [vmem:[#allocation7 + $0x58] sm:$0xff]   ;;  %v1505_v34 = vld [vmem:[#allocation7 + $0x60] sm:$0xff]   ;;  %s1645_s9 = scalar_lea.vmem %s1644_s30, 512  ;;  %p1646_p12 = scmp.lt.s32.totalorder %s2073_s29, %s1644_s30 }
  0x8e   : > { %1281 = vmatprep.subr.bf16.mxu0 %v1723_v0  ;;  %1335 = vmatprep.subr.bf16.mxu1 %v1723_v0  ;;  %v1504_v33 = vld [vmem:[#allocation7 + $0x18] sm:$0xff]   ;;  %v1506_v35 = vld [vmem:[#allocation7 + $0x20] sm:$0xff]   ;;  %v1507_v36 = vld [vmem:[#allocation7 + $0x68] sm:$0xff]   ;;  %p1641_p3 = pnand %p1640_p10, %p1923_p5  ;;  %p1647_p1 = scmp.lt.s32.totalorder %s1645_s9, %s1639_s20 }
  0x8f   : > { %v1508_v37 = vld [vmem:[#allocation7 + $0x28] sm:$0xff]   ;;  %v1509_v38 = vld [vmem:[#allocation7 + $0x70] sm:$0xff]   ;;  %v1511_v40 = vld [vmem:[#allocation7 + $0x78] sm:$0xff]  }
  0x90   : > { %v1510_v39 = vld [vmem:[#allocation7 + $0x30] sm:$0xff]   ;;  %v1512_v41 = vld [vmem:[#allocation7 + $0x38] sm:$0xff]   ;;  %v1184_v53 = vld [vmem:[%s2124_s2] ss:$0 sm:$0xff]  ;;  %p1642_p7 = pneg %p1641_p3  ;;  %p1648_p2 = por %p1647_p1, %p1646_p12 }
  0x91   : > { %1282 = vmatpush3.bf16.msra.mxu0 %v1487_v3  ;;  %1336 = vmatpush3.bf16.msra.mxu1 %v1500_v29  ;;  %vm1202_vm6 = vmpackc.low %vm1725_vm5, %vm1201_vm4  ;;  %v1513_v7 = vld [vmem:[#allocation7 + $0x80] sm:$0xff]   ;;  %v1514_v11 = vld [vmem:[#allocation7 + $0x88] sm:$0xff]  }
  0x92   : > { %1283 = vmatprep.subr.bf16.mxu0 %v1723_v0  ;;  %1337 = vmatprep.subr.bf16.mxu1 %v1723_v0  ;;  %v1518_v15 = vld [vmem:[#allocation7 + $0xa8] sm:$0xff]   ;;  %vm1213_vm7 = vmpackc.low %vm353_vm3, %vm1725_vm5  ;;  %v1523_v20 = vld [vmem:[#allocation8 + $0x10] sm:$0xff]   ;;  %p1649_p4 = pnand %p1648_p2, %p1642_p7 }
  0x93   : > { %v1522_v19 = vld [vmem:[#allocation8 + $0x8] sm:$0xff]  }
  0x95   : > { %1284 = vmatpush3.bf16.msra.mxu0 %v1488_v5  ;;  %1338 = vmatpush3.bf16.msra.mxu1 %v1502_v31 }
  0x96   : > { %1289 = vmatprep.subr.bf16.mxu0 %v1723_v0  ;;  %1339 = vmatprep.subr.bf16.mxu1 %v1723_v0 }
  0x98   : > { %1286 = vmatmul.mubr.msk.bf16.vlgmr.msra.gmra.mrb[0].mxu0 %vm403_vm2, %v1998_v9 }
  0x99   : > { %1290 = vmatpush3.bf16.msra.mxu0 %v1489_v10  ;;  %1297 = vmatprep.mubr.msk.bf16.mxu0 %vm1724_vm0, %v1723_v0 }
  0x9a   : > { %1291 = vmatprep.subr.bf16.mxu0 %v1723_v0  ;;  %1340 = vmatpush3.bf16.msra.mxu1 %v1504_v33 }
  0x9b   : > { %1341 = vmatprep.subr.bf16.mxu1 %v1723_v0 }
  0x9d   : > { %1292 = vmatpush3.bf16.msra.mxu0 %v1490_v12  ;;  %v1515_v12 = vld [vmem:[#allocation7 + $0x90] sm:$0xff]  }
  0x9e   : > { %1293 = vmatprep.subr.bf16.mxu0 %v1723_v0  ;;  %1342 = vmatpush3.bf16.msra.mxu1 %v1506_v35 }
  0x9f   : > { %1343 = vmatprep.subr.bf16.mxu1 %v1723_v0 }
  0xa1   : > { %1294 = vmatpush3.bf16.msra.mxu0 %v1491_v13  ;;  %v1516_v13 = vld [vmem:[#allocation7 + $0x98] sm:$0xff]  }
  0xa2   : > { %1295 = vmatprep.subr.bf16.mxu0 %v1723_v0  ;;  %1344 = vmatpush3.bf16.msra.mxu1 %v1508_v37 }
  0xa3   : > { %1345 = vmatprep.subr.bf16.mxu1 %v1723_v0 }
  0xa5   : > { %1296 = vmatpush3.bf16.msra.mxu0 %v1492_v14  ;;  %v1517_v14 = vld [vmem:[#allocation7 + $0xa0] sm:$0xff]  }
  0xa6   : > { %1301 = vmatprep.subr.bf16.mxu0 %v1723_v0  ;;  %1346 = vmatpush3.bf16.msra.mxu1 %v1510_v39 }
  0xa7   : > { %1347 = vmatprep.subr.bf16.mxu1 %v1723_v0 }
  0xa8   : > { %1298 = vmatmul.mubr.msk.bf16.vlgmr.msra.gmra.mrb[4].mxu0 %vm403_vm2, %v360_v17  ;;  %v1520_v17 = vld [vmem:[#allocation7 + $0xb8] sm:$0xff]  }
  0xa9   : > { %1302 = vmatpush3.bf16.msra.mxu0 %v1493_v16  ;;  %1309 = vmatprep.mubr.msk.bf16.mxu0 %vm1724_vm0, %v1723_v0  ;;  %v1519_v16 = vld [vmem:[#allocation7 + $0xb0] sm:$0xff]  }
  0xaa   : > { %1303 = vmatprep.subr.bf16.mxu0 %v1723_v0  ;;  %1348 = vmatpush3.bf16.msra.mxu1 %v1512_v41 }
  0xab   : > { %1353 = vmatprep.subr.bf16.mxu1 %v1723_v0 }
  0xad   : > { %1304 = vmatpush3.bf16.msra.mxu0 %v1494_v18  ;;  %v1521_v18 = vld [vmem:[#allocation8] sm:$0xff]  }
  0xae   : > { %1305 = vmatprep.subr.bf16.mxu0 %v1723_v0 }
  0xb1   : > { %1306 = vmatpush3.bf16.msra.mxu0 %v1495_v21  ;;  %v1524_v21 = vld [vmem:[#allocation8 + $0x18] sm:$0xff]  }
  0xb2   : > { %1307 = vmatprep.subr.bf16.mxu0 %v1723_v0 }
  0xb5   : > { %1308 = vmatpush3.bf16.msra.mxu0 %v1496_v22 }
  0xb6   : > { %1313 = vmatprep.subr.bf16.mxu0 %v1723_v0 }
  0xb8   : > { %1310 = vmatmul.mubr.msk.bf16.vlgmr.msra.gmra.mrb[8].mxu0 %vm403_vm2, %v516_v25 }
  0xb9   : > { %1329 = vmatprep.mubr.msk.bf16.mxu0 %vm1724_vm0, %v1723_v0  ;;  %1314 = vmatpush3.bf16.msra.mxu0 %v1497_v26  ;;  %v1216_v26 = vld [vmem:[%s2126_s4] ss:$0 sm:$0xff] }
  0xba   : > { %1315 = vmatprep.subr.bf16.mxu0 %v1723_v0 }
  0xbd   : > { %1316 = vmatpush3.bf16.msra.mxu0 %v1499_v28  ;;  %v1217_v28 = vld [vmem:[%s2128_s6] ss:$0 sm:$0xff] }
  0xbe   : > { %1317 = vmatprep.subr.bf16.mxu0 %v1723_v0 }
  0xc1   : > { %1318 = vmatpush3.bf16.msra.mxu0 %v1501_v30 }
  0xc2   : > { %1319 = vmatprep.subr.bf16.mxu0 %v1723_v0 }
  0xc5   : > { %1320 = vmatpush3.bf16.msra.mxu0 %v1503_v32 }
  0xc6   : > { %1321 = vmatprep.subr.bf16.mxu0 %v1723_v0 }
  0xc9   : > { %1322 = vmatpush3.bf16.msra.mxu0 %v1505_v34 }
  0xca   : > { %1323 = vmatprep.subr.bf16.mxu0 %v1723_v0 }
  0xcd   : > { %1324 = vmatpush3.bf16.msra.mxu0 %v1507_v36 }
  0xce   : > { %1325 = vmatprep.subr.bf16.mxu0 %v1723_v0 }
  0xd1   : > { %1326 = vmatpush3.bf16.msra.mxu0 %v1509_v38 }
  0xd2   : > { %1327 = vmatprep.subr.bf16.mxu0 %v1723_v0 }
  0xd5   : > { %1328 = vmatpush3.bf16.msra.mxu0 %v1511_v40 }
 0x16b   : > { %v441_v42 = vpop.f32.mrb[0].mxu0 }
 0x16c   : > { %v1287_v43 = vpop.f32.mrb[1].mxu0 }
 0x16d   : > { %v444_v44 = vpop.f32.mrb[2].mxu0 }
 0x16e   : > { %v1288_v45 = vpop.f32.mrb[3].mxu0 }
 0x17b   : > { %v509_v46 = vpop.f32.mrb[4].mxu0 }
 0x17c   : > { %v510_v47 = vadd.f32 %v509_v46, %v441_v42  ;;  %v1299_v48 = vpop.f32.mrb[5].mxu0 }
 0x17d   : > { %v512_v49 = vpop.f32.mrb[6].mxu0 }
 0x17e   : > { %v513_v50 = vadd.f32 %v512_v49, %v444_v44  ;;  %v1300_v51 = vpop.f32.mrb[7].mxu0 }
 0x18b   : > { %v587_v52 = vpop.f32.mrb[8].mxu0 }
 0x18c   : > { %v594_v54 = vadd.f32 %v587_v52, %v510_v47  ;;  %v1311_v55 = vpop.f32.mrb[9].mxu0 }
 0x18d   : > { %v590_v56 = vpop.f32.mrb[10].mxu0 }
 0x18e   : > { %v603_v57 = vadd.f32 %v1184_v53, %v594_v54  ;;  %v595_v58 = vadd.f32 %v590_v56, %v513_v50  ;;  %v1312_v59 = vpop.f32.mrb[11].mxu0 }
 0x190   : > { %v605_v60 = vmax.f32 %v603_v57, 0.0  ;;  %v604_v61 = vadd.f32 %v1184_v53, %v595_v58 }
 0x192   : > { %v606_v62 = vmax.f32 %v604_v61, 0.0  ;;  %v609_v63 = vrot.slane %v605_v60, 7  ;;  %v615_v1 = vrot.slane %v605_v60, 1 }
 0x194   : > { %v610_v2 = vrot.slane %v606_v62, 7  ;;  %v616_v3 = vrot.slane %v606_v62, 1  ;;  %v638_v4 = vpack.c.bf16 %v606_v62, %v605_v60 }
 0x196   : > { %v617_v5 = vsel %vm353_vm3, %v615_v1, %v616_v3  ;;  %1330 = vmatmul.mubr.bf16.vlgmr.msra.gmra.mrb[12].mxu0 %v638_v4  ;;  %v611_v6 = vsel %vm346_vm1, %v609_v63, %v610_v2 }
 0x197   : > { %v1214_v8 = vpack.c.bf16 %v616_v3, %v617_v5  ;;  %v1203_v10 = vpack.c.bf16 %v611_v6, %v609_v63 }
 0x199   : > { %1350 = vmatmul.mubr.msk.bf16.vlgmr.msra.gmra.mrb[0].mxu1 %vm1202_vm6, %v1203_v10 }
 0x19a   : > { %1354 = vmatpush3.bf16.msra.mxu1 %v1513_v7  ;;  %1369 = vmatprep.mubr.msk.bf16.mxu1 %vm1724_vm0, %v1723_v0 }
 0x19b   : > { %1355 = vmatprep.subr.bf16.mxu1 %v1723_v0 }
 0x19e   : > { %1356 = vmatpush3.bf16.msra.mxu1 %v1514_v11 }
 0x19f   : > { %1357 = vmatprep.subr.bf16.mxu1 %v1723_v0 }
 0x1a2   : > { %1358 = vmatpush3.bf16.msra.mxu1 %v1515_v12 }
 0x1a3   : > { %1359 = vmatprep.subr.bf16.mxu1 %v1723_v0 }
 0x1a6   : > { %1360 = vmatpush3.bf16.msra.mxu1 %v1516_v13 }
 0x1a7   : > { %1361 = vmatprep.subr.bf16.mxu1 %v1723_v0 }
 0x1aa   : > { %1362 = vmatpush3.bf16.msra.mxu1 %v1517_v14 }
 0x1ab   : > { %1363 = vmatprep.subr.bf16.mxu1 %v1723_v0 }
 0x1ae   : > { %1364 = vmatpush3.bf16.msra.mxu1 %v1518_v15 }
 0x1af   : > { %1365 = vmatprep.subr.bf16.mxu1 %v1723_v0 }
 0x1b2   : > { %1366 = vmatpush3.bf16.msra.mxu1 %v1519_v16 }
 0x1b3   : > { %1367 = vmatprep.subr.bf16.mxu1 %v1723_v0 }
 0x1b6   : > { %1368 = vmatpush3.bf16.msra.mxu1 %v1520_v17 }
 0x1b7   : > { %1373 = vmatprep.subr.bf16.mxu1 %v1723_v0 }
 0x1b9   : > { %1370 = vmatmul.mubr.msk.bf16.vlgmr.msra.gmra.mrb[0].mxu1 %vm1213_vm7, %v1214_v8 }
 0x1ba   : > { %1374 = vmatpush3.bf16.msra.mxu1 %v1521_v18  ;;  %1381 = vmatprep.mubr.msk.bf16.mxu1 %vm1724_vm0, %v1723_v0 }
 0x1bb   : > { %1375 = vmatprep.subr.bf16.mxu1 %v1723_v0 }
 0x1be   : > { %1376 = vmatpush3.bf16.msra.mxu1 %v1522_v19 }
 0x1bf   : > { %1377 = vmatprep.subr.bf16.mxu1 %v1723_v0 }
 0x1c2   : > { %1378 = vmatpush3.bf16.msra.mxu1 %v1523_v20 }
 0x1c3   : > { %1379 = vmatprep.subr.bf16.mxu1 %v1723_v0 }
 0x1c6   : > { %1380 = vmatpush3.bf16.msra.mxu1 %v1524_v21 }
 0x1c9   : > { %1382 = vmatmul.mubr.msk.bf16.vlgmr.msra.gmra.mrb[0].mxu1 %vm403_vm2, %v1998_v9 }
 0x269   : > { %v738_v22 = vpop.f32.mrb[12].mxu0 }
 0x26a   : > { %v1331_v23 = vpop.f32.mrb[13].mxu0  ;;  %v1385_v27 = vadd.f32 %v1216_v26, %v738_v22 }
 0x26b   : > { %v741_v24 = vpop.f32.mrb[14].mxu0 }
 0x26c   : > { %v1332_v25 = vpop.f32.mrb[15].mxu0  ;;  %v1388_v29 = vadd.f32 %v1216_v26, %v741_v24  ;;  %v1386_v0 = vadd.f32 %v1385_v27, %v1217_v28 }
 0x26e   : > { %v1389_v32 = vadd.f32 %v1388_v29, %v1217_v28 }
 0x29c   : > { %v1025_v30 = vpop.f32.mrb[0].mxu1 }
 0x29d   : > { %v1387_v9 = vadd.f32 %v1386_v0, %v1025_v30  ;;  %v1383_v31 = vpop.f32.mrb[1].mxu1 }
 0x29e   : > { %v1028_v33 = vpop.f32.mrb[2].mxu1 }
 0x29f   : > { %v1034_v34 = vmax.f32 %v1387_v9, 0.0  ;;  %v1390_v35 = vadd.f32 %v1389_v32, %v1028_v33  ;;  %v1384_v36 = vpop.f32.mrb[3].mxu1 }
 0x2a1   : > { %1036 = vst [vmem:[%s340_s15] sm:$0xff] %v1034_v34  ;;  %v1035_v37 = vmax.f32 %v1390_v35, 0.0 }
 0x2a3   : > { %1037 = vst [vmem:[%s340_s15 + $0x8] sm:$0xff] %v1035_v37 }
 0x2a4   : > { %1652 = shalt.err (!%p1649_p4)
}
 0x2a5   : > { %s1653_s23 = scalar_lea.hbm %s2078_s13, 256  ;;  %s1657_s14 = scalar_lea.hbm %s2129_s7, 512 }
 0x2a6   : > { %p1654_p9 = scmp.ne.s32.totalorder %s2078_s13, %s1653_s23  ;;  %p1658_p8 = scmp.lt.u32.totalorder %s2078_s13, %s2129_s7 }
 0x2a7   : > { %p1659_p13 = scmp.lt.u32.totalorder %s1657_s14, %s1653_s23  ;;  %p1661_p10 = scmp.lt.u32.totalorder %s1653_s23, %s2078_s13 }
 0x2a8   : > { %p1655_p0 = pnand %p1654_p9, %p1923_p5 }
 0x2a9   : > { %p1660_p6 = por %p1659_p13, %p1658_p8 }
 0x2aa   : > { %p1656_p11 = pneg %p1655_p0 }
 0x2ab   : > { %p1662_p3 = por %p1661_p10, %p1660_p6 }
 0x2ad   : > { %p1663_p7 = pnand %p1662_p3, %p1656_p11 }
 0x2af   : > { %1666 = shalt.err (!%p1663_p7)
}
 0x2b0   : > { %s1727_s8 = smov 128   ;;  %s1728_s17 = smov 8  }
 0x2b1   : > { %1413 = dma.vmem_to_hbm [thread:$0]  (%p1923_p5), %s2073_s29, 256, %s2078_s13, %s1039_s16, %s1727_s8, %s1727_s8, %s1728_s17  }
 0x2b2 PF: > { %s2149_s20 = sld [smem:[#allocation15_spill]]  ;;  %s1067_s28 = sand.u32 1, %s1701_s24  }
 0x2b3   : > { %p2151_p1 = scmp.ge.s32.totalorder %s1713_s27, 2  ;;  %s1068_s30 = scalar_lea.sflag [#allocation4], %s1067_s28 }
 0x2b8   : > { %p2150_p12 = scmp.ne.s32.totalorder %s2149_s20, 0 }
 0x2ba   : > { %p1430_p2 = pnand %p2151_p1, %p2150_p12 }
 0x2bc   : > { %1696 = dma.done.wait (!%p1430_p2), %s1068_s30, 256  }
 0x2bd   : > { %1698 = vsyncadd (!%p1430_p2), %s1068_s30, 4294967040  ;;  %p22_p4 = scmp.ge.s32.totalorder %s1909_s22, 4   ;;  %s2152_s24 = smov %s1705_s25 }
 0x2be   : > { %s2153_s25 = smov %s1709_s26  ;;  %s2154_s26 = smov %s1919_s18 }
 0x2bf   : > { %s2155_s27 = smov %s1909_s22  ;;  %24 = sbr.rel (!%p22_p4) target bundleno = 7 (0x7), region = 109 }
 0x2c6   :  { %1073 = vsyncpa [#allocation3], 1 }
 0x2c7   :  { %1075 = vsyncpa [#allocation3 + $0x1], 1 }
 0x2c8   :  { %1076 = vsyncpa [#allocation6], 1 }
 0x2c9   :  { %1077 = vsyncpa [#allocation9], 1 }
 0x2ca   :  { %1078 = vsyncpa [#allocation4], 1 }
 0x2cb   :  { %1080 = vsyncpa [#allocation4 + $0x1], 1 }

</bundles_post_ra>
